<compile_context>
chip_gen: v5e
topology: v5e:2x2
jax: 0.10.0
libtpu: 0.0.40
codegen_flags: <defaults>
</compile_context>

<pallas_src>
import functools

import jax
import jax.numpy as jnp
from jax.experimental import pallas as pl
from jax.experimental.pallas import tpu as pltpu


def _round_up(x: int, m: int) -> int:
    return (x + m - 1) // m * m


# ---------------------------------------------------------------------------
# Kernel: one N-tile of the fused MTLR head: o = x @ W_t + b  (f32 accumulate)
# ---------------------------------------------------------------------------
def mtlr_kernel(x_ref, w_ref, b_ref, o_ref):
    x = x_ref[...].astype(w_ref.dtype)                 # no-op when both f32
    z = jnp.dot(x, w_ref[...], preferred_element_type=jnp.float32)
    o_ref[...] = (z + b_ref[...]).astype(o_ref.dtype)  # f32 bias add + store


# ---------------------------------------------------------------------------
# Parameter fold (do this ONCE if weights are static across calls)
# ---------------------------------------------------------------------------
def fold_mtlr_params(weight, bias, G, *, compute_dtype=jnp.float32):
    """Fold the constant G buffer into the learnable parameters.

    weight : (K, F), bias : (K,), G : (K, K+1)
    Returns w_t : (F, K+1) in `compute_dtype`, b_eff : (1, K+1) f32.
    (x W^T + b) G == x (W^T G) + (b G)   -- exact fold in f32.
    """
    w_t = weight.T.astype(jnp.float32) @ G.astype(jnp.float32)       # (F, K+1)
    b_eff = bias.astype(jnp.float32) @ G.astype(jnp.float32)         # (K+1,)
    return w_t.astype(compute_dtype), b_eff.reshape(1, -1).astype(jnp.float32)


# ---------------------------------------------------------------------------
# Tile sizing: pick N-tile rows from a VMEM byte budget (lane padding aware)
# ---------------------------------------------------------------------------
def _choose_tile_n(N, F, kout, x_itemsize, w_itemsize, budget_bytes):
    lane_f = _round_up(F, 128)      # x block occupies 128-lane-padded rows
    lane_o = _round_up(kout, 128)   # out block likewise
    # x (double-buffered) + out f32 (double-buffered) [+ in-kernel cast temp]
    per_row = 2 * lane_f * x_itemsize + 2 * lane_o * 4
    if w_itemsize != x_itemsize:
        per_row += lane_f * w_itemsize
    tn = max(8, (budget_bytes // per_row) // 8 * 8)
    # Keep >= 4 grid steps on large inputs so v7x's two TensorCores both get
    # work via the ("parallel",) axis and the DMA pipeline stays primed.
    if N >= 4 * 1024:
        tn = min(tn, max(1024, _round_up(pl.cdiv(N, 4), 8)))
    if N <= tn:
        return N            # single full-extent block: no (8,*) divisibility needed
    return tn               # multiple of 8; partial last block is masked by Pallas


# ---------------------------------------------------------------------------
# Forward with pre-folded parameters (hot path)
# ---------------------------------------------------------------------------
@functools.partial(jax.jit, static_argnames=("vmem_budget_bytes",))
def mtlr_forward_folded(x, w_t, b_eff, *, vmem_budget_bytes=24 * 1024 * 1024):
    """out = x @ w_t + b_eff  ==  (x @ W^T + b) @ G.

    x     : (N, F)     f32 or bf16 activations
    w_t   : (F, Kout)  folded weight (f32 default)
    b_eff : (1, Kout)  folded bias (f32)
    returns (N, Kout) f32
    """
    N, F = x.shape
    kout = w_t.shape[1]
    assert w_t.shape[0] == F and b_eff.shape == (1, kout)

    x_isz = jnp.dtype(x.dtype).itemsize
    w_isz = jnp.dtype(w_t.dtype).itemsize
    tn = _choose_tile_n(N, F, kout, x_isz, w_isz, vmem_budget_bytes)
    grid = (pl.cdiv(N, tn),)   # no padding: Pallas masks the partial last block

    # VMEM actually needed by this config (lane-padded), plus slack.
    lane_f = _round_up(F, 128)
    lane_o = _round_up(kout, 128)
    tile_bytes = (2 * tn * lane_f * x_isz            # x blocks (double-buffered)
                  + 2 * tn * lane_o * 4              # out blocks (double-buffered)
                  + 2 * _round_up(F, 8) * lane_o * w_isz   # resident W buffers
                  + 2 * 8 * lane_o * 4)              # resident bias buffers
    if w_isz != x_isz:
        tile_bytes += tn * lane_f * w_isz            # in-kernel cast temp
    vmem_limit = int(min(tile_bytes + (4 << 20), 128 << 20))

    cost = pl.CostEstimate(
        flops=2 * N * F * kout,
        transcendentals=0,
        bytes_accessed=N * F * x_isz + N * kout * 4 + F * kout * w_isz + kout * 4,
    )

    return pl.pallas_call(
        mtlr_kernel,
        out_shape=jax.ShapeDtypeStruct((N, kout), jnp.float32),
        grid_spec=pltpu.PrefetchScalarGridSpec(
            num_scalar_prefetch=0,
            grid=grid,
            in_specs=[
                pl.BlockSpec((tn, F), lambda i: (i, 0)),    # x tile (pipelined)
                pl.BlockSpec((F, kout), lambda i: (0, 0)),  # folded W (resident)
                pl.BlockSpec((1, kout), lambda i: (0, 0)),  # folded bias (resident)
            ],
            out_specs=pl.BlockSpec((tn, kout), lambda i: (i, 0)),
        ),
        compiler_params=pltpu.CompilerParams(
            dimension_semantics=("parallel",),   # megacore split on v7x
            vmem_limit_bytes=vmem_limit,
        ),
        cost_estimate=cost,
    )(x, w_t, b_eff)


# ---------------------------------------------------------------------------
# Convenience forward matching BaseMTLR.forward (folds per call)
# ---------------------------------------------------------------------------
def mtlr_forward(x, weight, bias, G, *, compute_dtype=jnp.float32,
                 vmem_budget_bytes=24 * 1024 * 1024):
    """x:(N,F), weight:(K,F), bias:(K,), G:(K,K+1)  ->  (N, K+1) f32."""
    w_t, b_eff = fold_mtlr_params(weight, bias, G, compute_dtype=compute_dtype)
    return mtlr_forward_folded(x, w_t, b_eff, vmem_budget_bytes=vmem_budget_bytes)


def make_params(key, in_features, num_time_bins):
    """Deterministic init matching BaseMTLR.reset_parameters()."""
    K = num_time_bins                                   # weight rows
    std = (2.0 / (in_features + K)) ** 0.5              # xavier_normal_
    weight = std * jax.random.normal(key, (K, in_features), dtype=jnp.float32)
    bias = jnp.zeros((K,), dtype=jnp.float32)
    G = jnp.tril(jnp.ones((K, K + 1), dtype=jnp.float32))
    return weight, bias, G


if __name__ == "__main__":
    batch = 8
    in_features = 32
    num_time_bins = 8          # module internally uses num_time_bins + 1 = 9 bins

    key = jax.random.PRNGKey(0)
    k_x, k_w = jax.random.split(key)

    x = jax.random.normal(k_x, (batch, in_features), dtype=jnp.float32)
    weight, bias, G = make_params(k_w, in_features, num_time_bins)

    # Preferred serving path: fold G into the parameters once, reuse.
    w_t, b_eff = fold_mtlr_params(weight, bias, G)
    out = jax.block_until_ready(mtlr_forward_folded(x, w_t, b_eff))

    # Convenience path (fold executed per call).
    out2 = jax.block_until_ready(mtlr_forward(x, weight, bias, G))

    # Reference (exact module math).
    ref = (x @ weight.T + bias) @ G
    assert out.shape == (batch, num_time_bins + 1), out.shape
    assert out2.shape == (batch, num_time_bins + 1), out2.shape
    assert jnp.allclose(out, ref, atol=5e-2, rtol=5e-2)
    assert jnp.allclose(out2, ref, atol=5e-2, rtol=5e-2)

    print("KERNEL_OK")
</pallas_src>

<mosaic_0001>
module attributes {stable_mosaic.version = 11 : i64} {
  func.func @mtlr_kernel(%arg0: i32, %arg1: memref<8x32xf32, #tpu.memory_space<vmem>>, %arg2: memref<32x9xf32, #tpu.memory_space<vmem>>, %arg3: memref<1x9xf32, #tpu.memory_space<vmem>>, %arg4: memref<8x9xf32, #tpu.memory_space<vmem>>) attributes {dimension_semantics = [#tpu.dimension_semantics<parallel>], iteration_bounds = array<i64: 1>, scalar_prefetch = 0 : i64, scratch_operands = 0 : i64, tpu.core_type = #tpu.core_type<tc>, window_params = [{transform_indices = @transform_0, window_bounds = array<i64: 8, 32>}, {pipeline_mode = #tpu.pipeline_mode<synchronous>, transform_indices = @transform_1, window_bounds = array<i64: 32, 9>}, {pipeline_mode = #tpu.pipeline_mode<synchronous>, transform_indices = @transform_2, window_bounds = array<i64: 1, 9>}, {transform_indices = @transform_3, window_bounds = array<i64: 8, 9>}]} {
    %c0 = arith.constant 0 : index
    %c0_0 = arith.constant 0 : index
    %0 = vector.load %arg1[%c0, %c0_0] : memref<8x32xf32, #tpu.memory_space<vmem>>, vector<8x32xf32>
    %c0_1 = arith.constant 0 : index
    %c0_2 = arith.constant 0 : index
    %1 = vector.load %arg2[%c0_1, %c0_2] : memref<32x9xf32, #tpu.memory_space<vmem>>, vector<32x9xf32>
    %cst = arith.constant dense<0.000000e+00> : vector<8x9xf32>
    %2 = tpu.matmul %0, %1, %cst {dimension_numbers = #tpu.dot_dimension_numbers<[1], [0], [0], [1], [0, 0, 1, 1], [], []>} : vector<8x32xf32>, vector<32x9xf32>, vector<8x9xf32> -> vector<8x9xf32>
    %c0_3 = arith.constant 0 : index
    %c0_4 = arith.constant 0 : index
    %3 = vector.load %arg3[%c0_3, %c0_4] : memref<1x9xf32, #tpu.memory_space<vmem>>, vector<1x9xf32>
    %4 = vector.broadcast %3 : vector<1x9xf32> to vector<8x9xf32>
    %5 = arith.addf %2, %4 : vector<8x9xf32>
    %c0_5 = arith.constant 0 : index
    %c0_6 = arith.constant 0 : index
    %6 = vector.load %arg4[%c0_5, %c0_6] : memref<8x9xf32, #tpu.memory_space<vmem>>, vector<8x9xf32>
    tpu.vector_store %arg4[%c0_5, %c0_6], %5 {strides = array<i32>} : memref<8x9xf32, #tpu.memory_space<vmem>>, vector<8x9xf32>,
    return
  }
  func.func @transform_0(%arg0: i32) -> (i32, i32) {
    %c0_i32 = arith.constant 0 : i32
    %c0_i32_0 = arith.constant 0 : i32
    return %arg0, %c0_i32 : i32, i32
  }
  func.func @transform_1(%arg0: i32) -> (i32, i32) {
    %c0_i32 = arith.constant 0 : i32
    %c0_i32_0 = arith.constant 0 : i32
    %c0_i32_1 = arith.constant 0 : i32
    return %c0_i32, %c0_i32_0 : i32, i32
  }
  func.func @transform_2(%arg0: i32) -> (i32, i32) {
    %c0_i32 = arith.constant 0 : i32
    %c0_i32_0 = arith.constant 0 : i32
    %c0_i32_1 = arith.constant 0 : i32
    return %c0_i32, %c0_i32_0 : i32, i32
  }
  func.func @transform_3(%arg0: i32) -> (i32, i32) {
    %c0_i32 = arith.constant 0 : i32
    %c0_i32_0 = arith.constant 0 : i32
    return %arg0, %c0_i32 : i32, i32
  }
}

</mosaic_0001>

<bundles_post_ra>
// kernel: mtlr_forward_folded.1
= control target key start
LH: loop header
LB: loop body
LE: loop exit
PB: predicated region body
PF: predicated region fallthrough
CT: control target
= control target key end

     0   :  { %s137_s0 = inlined_call_operand.vmem [shape: f32[8,32], index: 0, kind: input, shape index: {}]   ;;  %s138_s1 = inlined_call_operand.vmem [shape: f32[32,9], index: 1, kind: input, shape index: {}]   ;;  %s139_s2 = inlined_call_operand.vmem [shape: f32[1,9], index: 2, kind: input, shape index: {}]   ;;  %s140_s3 = inlined_call_operand.hbm [shape: f32[8,9], index: 3, kind: output, shape index: {}]  }
   0x1   :  { %v19_v0 = vld [vmem:[%s138_s1 + $0x18] sm:$0xff]  ;;  %v18_v1 = vld [vmem:[%s138_s1 + $0x10] sm:$0xff]  ;;  %v17_v2 = vld [vmem:[%s138_s1 + $0x8] sm:$0xff] }
   0x2   :  { %40 = vmatpush.msra.mxu0 %v19_v0 }
   0x3   :  { %8 = vsyncpa [#allocation3], 0  ;;  %v16_v3 = vld [vmem:[%s138_s1] sm:$0xff]  ;;  %vm24_vm0 = vcmask 261120   ;;  %s95_s24 = smov [#allocation2]   ;;  %s57_s28 = sshll.u32 %s140_s3, 4  ;;  %s58_s28 = int_to_ptr.hbm [resolvable:$true] %s57_s28 }
   0x4   :  { %41 = vmatpush.msra.mxu0 %v18_v1  ;;  %v15_v4 = vld [vmem:[%s137_s0] sm:$0xff]  ;;  %s55_s25 = sshll.u32 %s95_s24, 4  ;;  %vm48_vm1 = vcmask 72704   ;;  %s56_s25 = int_to_ptr.vmem [resolvable:$true] %s55_s25 }
   0x5   :  { %v68_v5 = vld [vmem:[%s139_s2] ss:$0 sm:$0xff] }
   0x6   :  { %42 = vmatpush.msra.mxu0 %v17_v2 }
   0x8   :  { %43 = vmatpush.msra.mxu0 %v16_v3 }
   0x9   :  { %66 = vmatmul.msk.f32.vlgmr.msra.gmra.mxu0 %vm24_vm0, %v15_v4 }
  0x86   :  { %v45_v6 = vpop.f32.mrf.mxu0 }
  0x87   :  { %v46_v7 = vadd.f32 %v68_v5, %v45_v6 }
  0x89   :  { %49 = vst.msk [vmem:[#allocation2] sm:$0xff] %vm48_vm1, %v46_v7 }
  0x8a   :  { %60 = dma.vmem_to_hbm [thread:$0]  %s56_s25, 128, %s58_s28, [#allocation3]  }
  0x8b   :  { %93 = dma.done.wait [#allocation3], 128  }
  0x8c   :  { %94 = vsyncadd [#allocation3], 4294967168 }
  0x8d   :  { %65 = vsyncpa [#allocation3], 1 }

</bundles_post_ra>
